<compile_context>
chip_gen: v5e
topology: v5e:2x2
jax: 0.10.0
libtpu: 0.0.40
codegen_flags: <defaults>
</compile_context>

<pallas_src>
import jax
import jax.numpy as jnp
from jax.experimental import pallas as pl
from jax.experimental.pallas import tpu as pltpu


def _round_up(n, m):
    return ((n + m - 1) // m) * m


# ---------------------------------------------------------------------------
# Fused kernel: conv(3x3)+bias+ReLU  ->  NCHW flatten  ->  Linear  ->  Softmax
# ---------------------------------------------------------------------------
def _nima_fused_kernel(x_ref, tmat_ref, wcls_ref, fbias_ref, o_ref):
    TB, Hp2, slab = x_ref.shape          # (batch tile, H+2 padded rows, lane-padded (W+2)*Cin)
    H = Hp2 - 2
    WC = tmat_ref.shape[1]               # W * Cout (lane-dense conv output width)

    # ---- Conv2d(3x3, pad=1) + bias + ReLU as ONE lane-dense MXU matmul.
    # Each output row's receptive field = 3 dy-shifted row windows of the
    # padded activation, lane-concatenated (aligned: slab is a 128 multiple).
    # The activation is streamed from HBM only once; the 3x replication
    # happens in registers.  The conv bias rides in the ones column of the
    # dy=0 slab (padded lanes), so no post-matmul broadcast add is needed.
    lhs = jnp.concatenate([x_ref[:, dy:dy + H, :] for dy in range(3)], axis=-1)
    lhs = lhs.reshape(TB * H, 3 * slab)                      # (M, K) bf16, M = TB*H
    conv = jnp.dot(lhs, tmat_ref[...],
                   preferred_element_type=jnp.float32)       # (M, WC) f32 on the MXU
    feat = jnp.maximum(conv, 0.0).astype(jnp.bfloat16)       # ReLU (f32), then bf16

    # ---- torch NCHW flatten + Linear, also on the MXU.
    # Build the per-image flattened feature row (TB, H*WC) by an aligned lane
    # concat of the H row slabs (the classifier weight was pre-permuted at
    # trace time to match this (h, w, cout) ordering).
    feat3 = feat.reshape(TB, H, WC)
    feat_flat = jnp.concatenate([feat3[:, h, :] for h in range(H)], axis=-1)
    logits = jnp.dot(feat_flat, wcls_ref[...],
                     preferred_element_type=jnp.float32) + fbias_ref[...]   # (TB, C)

    # ---- Softmax over classes, exact divide (runs once per image tile).
    m = jnp.max(logits, axis=-1, keepdims=True)
    e = jnp.exp(logits - m)
    o_ref[...] = e / jnp.sum(e, axis=-1, keepdims=True)


# ---------------------------------------------------------------------------
# Wrapper: trace-time weight restructuring + pallas_call plumbing
# ---------------------------------------------------------------------------
def nima_forward(x, params, *, batch_tile=None):
    """Fused NIMA forward pass (eval mode).  x: (B, Cin, H, W) float32 NCHW."""
    conv_w, conv_b = params["conv_w"], params["conv_b"]
    fc_w, fc_b = params["fc_w"], params["fc_b"]

    B, Cin, H, W = x.shape
    Cout, _, KH, KW = conv_w.shape
    C = fc_w.shape[0]
    assert (KH, KW) == (3, 3)
    assert fc_w.shape[1] == Cout * H * W

    # Images per grid step.  M of the conv dot = TB * H; for large B pick a
    # TB that is a multiple of 8 and leaves >=2 grid blocks (v7x has 2 TCs).
    TB = B if batch_tile is None else batch_tile
    assert B % TB == 0 and (TB == B or TB % 8 == 0), "illegal batch tile"

    WC = W * Cout                          # lane-dense conv output width
    WCin = (W + 2) * Cin                   # one padded activation row, flattened
    SLAB = _round_up(WCin + 1, 128)        # +1 ones column (bias fold), lane aligned
    K = 3 * SLAB                           # flattened receptive field per out row
    F = H * WC                             # flattened feature size per image

    # ---- activations: NCHW -> padded NHWC, (w, cin) flattened per row,
    #      lane-padded to SLAB with a ones column for the bias fold, bf16.
    xp = jnp.pad(jnp.transpose(x, (0, 2, 3, 1)), ((0, 0), (1, 1), (1, 1), (0, 0)))
    xslab = xp.reshape(B, H + 2, WCin)
    xslab = jnp.pad(xslab, ((0, 0), (0, 0), (0, SLAB - WCin)))
    xslab = xslab.at[:, :, WCin].set(1.0).astype(jnp.bfloat16)   # (B, H+2, SLAB)

    # ---- conv weight as a Toeplitz matrix (3*SLAB, W*Cout), bf16 on the MXU.
    # tmat[dy*SLAB + wp*Cin + ci, w*Cout + co] = conv_w[co, ci, dy, wp - w]
    # plus a bias row (dy=0 slab, column WCin -> the ones column of xslab).
    w_d = jnp.transpose(conv_w, (2, 3, 1, 0))                    # (dy, dx, Cin, Cout)
    body = jnp.zeros((3, W + 2, Cin, W, Cout), jnp.float32)
    iw = jnp.arange(W)
    for dy in range(3):
        for dx in range(3):
            body = body.at[dy, iw + dx, :, iw, :].add(w_d[dy, dx])
    tmat = jnp.zeros((3, SLAB, W, Cout), jnp.float32)
    tmat = tmat.at[:, :WCin].set(body.reshape(3, WCin, W, Cout))
    tmat = tmat.at[0, WCin].set(jnp.broadcast_to(conv_b[None, :], (W, Cout)))
    tmat = tmat.reshape(K, WC).astype(jnp.bfloat16)

    # ---- classifier weight permuted from torch's NCHW flatten order
    #      (c*H*W + h*W + w) into the kernel's (h, w, cout) feature order;
    #      resident bf16 operand (constant index_map -> fetched once).
    wcls = jnp.transpose(fc_w.reshape(C, Cout, H, W), (2, 3, 1, 0))
    wcls = wcls.reshape(F, C).astype(jnp.bfloat16)
    fbias = fc_b.reshape(1, C).astype(jnp.float32)

    cost = pl.CostEstimate(
        flops=2 * B * H * K * WC + 2 * B * F * C,
        transcendentals=B * C,
        bytes_accessed=(xslab.size * 2 + tmat.size * 2 + wcls.size * 2
                        + fbias.size * 4 + B * C * 4),
    )

    out = pl.pallas_call(
        _nima_fused_kernel,
        out_shape=jax.ShapeDtypeStruct((B, C), jnp.float32),
        grid_spec=pl.GridSpec(
            grid=(B // TB,),
            in_specs=[
                pl.BlockSpec((TB, H + 2, SLAB), lambda b: (b, 0, 0)),
                pl.BlockSpec((K, WC), lambda b: (0, 0)),      # invariant (resident)
                pl.BlockSpec((F, C), lambda b: (0, 0)),       # invariant (resident)
                pl.BlockSpec((1, C), lambda b: (0, 0)),       # invariant (resident)
            ],
            out_specs=pl.BlockSpec((TB, C), lambda b: (b, 0)),
        ),
        compiler_params=pltpu.CompilerParams(
            dimension_semantics=("parallel",),
            vmem_limit_bytes=32 * 1024 * 1024,
        ),
        cost_estimate=cost,
    )(xslab, tmat, wcls, fbias)

    return out


# ---------------------------------------------------------------------------
# Pure-JAX reference (for correctness check)
# ---------------------------------------------------------------------------
def nima_reference(x, params):
    y = jax.lax.conv_general_dilated(
        x, params["conv_w"], window_strides=(1, 1),
        padding=((1, 1), (1, 1)),
        dimension_numbers=("NCHW", "OIHW", "NCHW"),
    )
    y = jnp.maximum(y + params["conv_b"][None, :, None, None], 0.0)
    y = y.reshape(y.shape[0], -1)                              # NCHW flatten
    logits = y @ params["fc_w"].T + params["fc_b"]
    return jax.nn.softmax(logits, axis=1)


# ---------------------------------------------------------------------------
if __name__ == "__main__":
    # Small, self-consistent shapes: batch=2, Cin=4, spatial=16x16,
    # synthetic `features` -> 8 channels, flattened F = 8*16*16 = 2048,
    # num_classes = 5 (as in NIMA(..., num_classes=5)).
    B, Cin, H, W = 2, 4, 16, 16
    Cout, NUM_CLASSES = 8, 5
    F = Cout * H * W

    key = jax.random.PRNGKey(0)
    kx, kcw, kcb, kfw, kfb = jax.random.split(key, 5)

    x = jax.random.normal(kx, (B, Cin, H, W), dtype=jnp.float32)
    params = {
        "conv_w": 0.1 * jax.random.normal(kcw, (Cout, Cin, 3, 3), jnp.float32),
        "conv_b": 0.1 * jax.random.normal(kcb, (Cout,), jnp.float32),
        "fc_w": (1.0 / jnp.sqrt(F)) *
                jax.random.normal(kfw, (NUM_CLASSES, F), jnp.float32),
        "fc_b": 0.1 * jax.random.normal(kfb, (NUM_CLASSES,), jnp.float32),
    }

    out = jax.block_until_ready(jax.jit(nima_forward)(x, params))
    ref = jax.block_until_ready(nima_reference(x, params))

    assert out.shape == (B, NUM_CLASSES), out.shape
    # Exact-divide softmax -> rows sum to 1 up to f32 rounding.
    assert jnp.allclose(jnp.sum(out, axis=1), 1.0, atol=1e-4)
    # Intentional precision choice: both matmuls use bf16 operands with f32
    # accumulation (inference), so compare against the f32 reference loosely.
    assert jnp.allclose(out, ref, atol=1e-2, rtol=1e-2), (out, ref)

    print("KERNEL_OK")
</pallas_src>

<mosaic_0001>
module attributes {stable_mosaic.version = 11 : i64} {
  func.func @_nima_fused_kernel(%arg0: i32, %arg1: memref<2x18x128xbf16, #tpu.memory_space<vmem>>, %arg2: memref<384x128xbf16, #tpu.memory_space<vmem>>, %arg3: memref<2048x5xbf16, #tpu.memory_space<vmem>>, %arg4: memref<1x5xf32, #tpu.memory_space<vmem>>, %arg5: memref<2x5xf32, #tpu.memory_space<vmem>>) attributes {dimension_semantics = [#tpu.dimension_semantics<parallel>], iteration_bounds = array<i64: 1>, scalar_prefetch = 0 : i64, scratch_operands = 0 : i64, tpu.core_type = #tpu.core_type<tc>, window_params = [{transform_indices = @transform_0, window_bounds = array<i64: 2, 18, 128>}, {pipeline_mode = #tpu.pipeline_mode<synchronous>, transform_indices = @transform_1, window_bounds = array<i64: 384, 128>}, {pipeline_mode = #tpu.pipeline_mode<synchronous>, transform_indices = @transform_2, window_bounds = array<i64: 2048, 5>}, {pipeline_mode = #tpu.pipeline_mode<synchronous>, transform_indices = @transform_3, window_bounds = array<i64: 1, 5>}, {transform_indices = @transform_4, window_bounds = array<i64: 2, 5>}]} {
    %c0 = arith.constant 0 : index
    %c0_0 = arith.constant 0 : index
    %c0_1 = arith.constant 0 : index
    %0 = vector.load %arg1[%c0, %c0_0, %c0_1] : memref<2x18x128xbf16, #tpu.memory_space<vmem>>, vector<2x16x128xbf16>
    %c0_2 = arith.constant 0 : index
    %c1 = arith.constant 1 : index
    %c0_3 = arith.constant 0 : index
    %1 = vector.load %arg1[%c0_2, %c1, %c0_3] : memref<2x18x128xbf16, #tpu.memory_space<vmem>>, vector<2x16x128xbf16>
    %c0_4 = arith.constant 0 : index
    %c2 = arith.constant 2 : index
    %c0_5 = arith.constant 0 : index
    %2 = vector.load %arg1[%c0_4, %c2, %c0_5] : memref<2x18x128xbf16, #tpu.memory_space<vmem>>, vector<2x16x128xbf16>
    %3 = tpu.concatenate %0, %1, %2 in 2 : vector<2x16x128xbf16>, vector<2x16x128xbf16>, vector<2x16x128xbf16> -> vector<2x16x384xbf16>
    %4 = vector.shape_cast %3 : vector<2x16x384xbf16> to vector<32x384xbf16>
    %c0_6 = arith.constant 0 : index
    %c0_7 = arith.constant 0 : index
    %5 = vector.load %arg2[%c0_6, %c0_7] : memref<384x128xbf16, #tpu.memory_space<vmem>>, vector<384x128xbf16>
    %cst = arith.constant dense<0.000000e+00> : vector<32x128xf32>
    %6 = tpu.matmul %4, %5, %cst {dimension_numbers = #tpu.dot_dimension_numbers<[1], [0], [0], [1], [0, 0, 1, 1], [], []>} : vector<32x384xbf16>, vector<384x128xbf16>, vector<32x128xf32> -> vector<32x128xf32>
    %cst_8 = arith.constant 0.000000e+00 : f32
    %7 = vector.broadcast %cst_8 : f32 to vector<32x128xf32>
    %8 = arith.maximumf %6, %7 : vector<32x128xf32>
    %9 = arith.truncf %8 : vector<32x128xf32> to vector<32x128xbf16>
    %10 = vector.shape_cast %9 : vector<32x128xbf16> to vector<2x16x128xbf16>
    %11 = vector.extract_strided_slice %10 {offsets = [0, 0, 0], sizes = [2, 1, 128], strides = [1, 1, 1]} : vector<2x16x128xbf16> to vector<2x1x128xbf16>
    %12 = vector.shape_cast %11 : vector<2x1x128xbf16> to vector<2x128xbf16>
    %13 = vector.extract_strided_slice %10 {offsets = [0, 1, 0], sizes = [2, 1, 128], strides = [1, 1, 1]} : vector<2x16x128xbf16> to vector<2x1x128xbf16>
    %14 = vector.shape_cast %13 : vector<2x1x128xbf16> to vector<2x128xbf16>
    %15 = vector.extract_strided_slice %10 {offsets = [0, 2, 0], sizes = [2, 1, 128], strides = [1, 1, 1]} : vector<2x16x128xbf16> to vector<2x1x128xbf16>
    %16 = vector.shape_cast %15 : vector<2x1x128xbf16> to vector<2x128xbf16>
    %17 = vector.extract_strided_slice %10 {offsets = [0, 3, 0], sizes = [2, 1, 128], strides = [1, 1, 1]} : vector<2x16x128xbf16> to vector<2x1x128xbf16>
    %18 = vector.shape_cast %17 : vector<2x1x128xbf16> to vector<2x128xbf16>
    %19 = vector.extract_strided_slice %10 {offsets = [0, 4, 0], sizes = [2, 1, 128], strides = [1, 1, 1]} : vector<2x16x128xbf16> to vector<2x1x128xbf16>
    %20 = vector.shape_cast %19 : vector<2x1x128xbf16> to vector<2x128xbf16>
    %21 = vector.extract_strided_slice %10 {offsets = [0, 5, 0], sizes = [2, 1, 128], strides = [1, 1, 1]} : vector<2x16x128xbf16> to vector<2x1x128xbf16>
    %22 = vector.shape_cast %21 : vector<2x1x128xbf16> to vector<2x128xbf16>
    %23 = vector.extract_strided_slice %10 {offsets = [0, 6, 0], sizes = [2, 1, 128], strides = [1, 1, 1]} : vector<2x16x128xbf16> to vector<2x1x128xbf16>
    %24 = vector.shape_cast %23 : vector<2x1x128xbf16> to vector<2x128xbf16>
    %25 = vector.extract_strided_slice %10 {offsets = [0, 7, 0], sizes = [2, 1, 128], strides = [1, 1, 1]} : vector<2x16x128xbf16> to vector<2x1x128xbf16>
    %26 = vector.shape_cast %25 : vector<2x1x128xbf16> to vector<2x128xbf16>
    %27 = vector.extract_strided_slice %10 {offsets = [0, 8, 0], sizes = [2, 1, 128], strides = [1, 1, 1]} : vector<2x16x128xbf16> to vector<2x1x128xbf16>
    %28 = vector.shape_cast %27 : vector<2x1x128xbf16> to vector<2x128xbf16>
    %29 = vector.extract_strided_slice %10 {offsets = [0, 9, 0], sizes = [2, 1, 128], strides = [1, 1, 1]} : vector<2x16x128xbf16> to vector<2x1x128xbf16>
    %30 = vector.shape_cast %29 : vector<2x1x128xbf16> to vector<2x128xbf16>
    %31 = vector.extract_strided_slice %10 {offsets = [0, 10, 0], sizes = [2, 1, 128], strides = [1, 1, 1]} : vector<2x16x128xbf16> to vector<2x1x128xbf16>
    %32 = vector.shape_cast %31 : vector<2x1x128xbf16> to vector<2x128xbf16>
    %33 = vector.extract_strided_slice %10 {offsets = [0, 11, 0], sizes = [2, 1, 128], strides = [1, 1, 1]} : vector<2x16x128xbf16> to vector<2x1x128xbf16>
    %34 = vector.shape_cast %33 : vector<2x1x128xbf16> to vector<2x128xbf16>
    %35 = vector.extract_strided_slice %10 {offsets = [0, 12, 0], sizes = [2, 1, 128], strides = [1, 1, 1]} : vector<2x16x128xbf16> to vector<2x1x128xbf16>
    %36 = vector.shape_cast %35 : vector<2x1x128xbf16> to vector<2x128xbf16>
    %37 = vector.extract_strided_slice %10 {offsets = [0, 13, 0], sizes = [2, 1, 128], strides = [1, 1, 1]} : vector<2x16x128xbf16> to vector<2x1x128xbf16>
    %38 = vector.shape_cast %37 : vector<2x1x128xbf16> to vector<2x128xbf16>
    %39 = vector.extract_strided_slice %10 {offsets = [0, 14, 0], sizes = [2, 1, 128], strides = [1, 1, 1]} : vector<2x16x128xbf16> to vector<2x1x128xbf16>
    %40 = vector.shape_cast %39 : vector<2x1x128xbf16> to vector<2x128xbf16>
    %41 = vector.extract_strided_slice %10 {offsets = [0, 15, 0], sizes = [2, 1, 128], strides = [1, 1, 1]} : vector<2x16x128xbf16> to vector<2x1x128xbf16>
    %42 = vector.shape_cast %41 : vector<2x1x128xbf16> to vector<2x128xbf16>
    %43 = tpu.concatenate %12, %14, %16, %18, %20, %22, %24, %26, %28, %30, %32, %34, %36, %38, %40, %42 in 1 : vector<2x128xbf16>, vector<2x128xbf16>, vector<2x128xbf16>, vector<2x128xbf16>, vector<2x128xbf16>, vector<2x128xbf16>, vector<2x128xbf16>, vector<2x128xbf16>, vector<2x128xbf16>, vector<2x128xbf16>, vector<2x128xbf16>, vector<2x128xbf16>, vector<2x128xbf16>, vector<2x128xbf16>, vector<2x128xbf16>, vector<2x128xbf16> -> vector<2x2048xbf16>
    %c0_9 = arith.constant 0 : index
    %c0_10 = arith.constant 0 : index
    %44 = vector.load %arg3[%c0_9, %c0_10] : memref<2048x5xbf16, #tpu.memory_space<vmem>>, vector<2048x5xbf16>
    %cst_11 = arith.constant dense<0.000000e+00> : vector<2x5xf32>
    %45 = tpu.matmul %43, %44, %cst_11 {dimension_numbers = #tpu.dot_dimension_numbers<[1], [0], [0], [1], [0, 0, 1, 1], [], []>} : vector<2x2048xbf16>, vector<2048x5xbf16>, vector<2x5xf32> -> vector<2x5xf32>
    %c0_12 = arith.constant 0 : index
    %c0_13 = arith.constant 0 : index
    %46 = vector.load %arg4[%c0_12, %c0_13] : memref<1x5xf32, #tpu.memory_space<vmem>>, vector<1x5xf32>
    %47 = vector.broadcast %46 : vector<1x5xf32> to vector<2x5xf32>
    %48 = arith.addf %45, %47 : vector<2x5xf32>
    %cst_14 = arith.constant dense<0xFF800000> : vector<2xf32>
    %49 = vector.multi_reduction <maximumf>, %48, %cst_14 [1] : vector<2x5xf32> to vector<2xf32>
    %50 = vector.shape_cast %49 : vector<2xf32> to vector<2x1xf32>
    %51 = vector.broadcast %50 : vector<2x1xf32> to vector<2x5xf32>
    %52 = arith.subf %48, %51 : vector<2x5xf32>
    %53 = math.exp %52 : vector<2x5xf32>
    %cst_15 = arith.constant dense<0.000000e+00> : vector<2xf32>
    %54 = vector.multi_reduction <add>, %53, %cst_15 [1] : vector<2x5xf32> to vector<2xf32>
    %55 = vector.shape_cast %54 : vector<2xf32> to vector<2x1xf32>
    %56 = vector.broadcast %55 : vector<2x1xf32> to vector<2x5xf32>
    %57 = arith.divf %53, %56 : vector<2x5xf32>
    %c0_16 = arith.constant 0 : index
    %c0_17 = arith.constant 0 : index
    %58 = vector.load %arg5[%c0_16, %c0_17] : memref<2x5xf32, #tpu.memory_space<vmem>>, vector<2x5xf32>
    tpu.vector_store %arg5[%c0_16, %c0_17], %57 {strides = array<i32>} : memref<2x5xf32, #tpu.memory_space<vmem>>, vector<2x5xf32>,
    return
  }
  func.func @transform_0(%arg0: i32) -> (i32, i32, i32) {
    %c0_i32 = arith.constant 0 : i32
    %c0_i32_0 = arith.constant 0 : i32
    %c0_i32_1 = arith.constant 0 : i32
    return %arg0, %c0_i32, %c0_i32_0 : i32, i32, i32
  }
  func.func @transform_1(%arg0: i32) -> (i32, i32) {
    %c0_i32 = arith.constant 0 : i32
    %c0_i32_0 = arith.constant 0 : i32
    %c0_i32_1 = arith.constant 0 : i32
    return %c0_i32, %c0_i32_0 : i32, i32
  }
  func.func @transform_2(%arg0: i32) -> (i32, i32) {
    %c0_i32 = arith.constant 0 : i32
    %c0_i32_0 = arith.constant 0 : i32
    %c0_i32_1 = arith.constant 0 : i32
    return %c0_i32, %c0_i32_0 : i32, i32
  }
  func.func @transform_3(%arg0: i32) -> (i32, i32) {
    %c0_i32 = arith.constant 0 : i32
    %c0_i32_0 = arith.constant 0 : i32
    %c0_i32_1 = arith.constant 0 : i32
    return %c0_i32, %c0_i32_0 : i32, i32
  }
  func.func @transform_4(%arg0: i32) -> (i32, i32) {
    %c0_i32 = arith.constant 0 : i32
    %c0_i32_0 = arith.constant 0 : i32
    return %arg0, %c0_i32 : i32, i32
  }
}

</mosaic_0001>

<bundles_post_ra>
// kernel: nima_forward.1
= control target key start
LH: loop header
LB: loop body
LE: loop exit
PB: predicated region body
PF: predicated region fallthrough
CT: control target
= control target key end

     0   :  { %s3100_s0 = inlined_call_operand.vmem [shape: bf16[2,18,128], index: 0, kind: input, shape index: {}]   ;;  %s3101_s1 = inlined_call_operand.vmem [shape: bf16[384,128], index: 1, kind: input, shape index: {}]   ;;  %s3102_s2 = inlined_call_operand.vmem [shape: bf16[2048,5], index: 2, kind: input, shape index: {}]   ;;  %s3103_s3 = inlined_call_operand.vmem [shape: f32[1,5], index: 3, kind: input, shape index: {}]   ;;  %s3104_s4 = inlined_call_operand.hbm [shape: f32[2,5], index: 4, kind: output, shape index: {}]  }
   0x1   :  { %v2333_v0 = vld [vmem:[%s3101_s1 + $0x38] sm:$0xff]  ;;  %v2332_v3 = vld [vmem:[%s3101_s1 + $0x30] sm:$0xff]  ;;  %v2331_v6 = vld [vmem:[%s3101_s1 + $0x28] sm:$0xff] }
   0x2   :  { %v2341_v1 = vld [vmem:[%s3101_s1 + $0x78] sm:$0xff]  ;;  %278 = vmatpush.bf16.msra.mxu0 %v2333_v0  ;;  %v2340_v4 = vld [vmem:[%s3101_s1 + $0x70] sm:$0xff]  ;;  %v2339_v7 = vld [vmem:[%s3101_s1 + $0x68] sm:$0xff] }
   0x3   :  { %v2349_v2 = vld [vmem:[%s3101_s1 + $0xb8] sm:$0xff]  ;;  %297 = vmatpush.bf16.msra.mxu1 %v2341_v1  ;;  %v2348_v5 = vld [vmem:[%s3101_s1 + $0xb0] sm:$0xff]  ;;  %v2347_v8 = vld [vmem:[%s3101_s1 + $0xa8] sm:$0xff] }
   0x4   :  { %316 = vmatpush.bf16.msra.mxu2 %v2349_v2  ;;  %v2330_v9 = vld [vmem:[%s3101_s1 + $0x20] sm:$0xff]  ;;  %v22_v12 = vld [vmem:[%s3100_s0 + $0x8] sm:$0x1] }
   0x5   :  { %v2338_v10 = vld [vmem:[%s3101_s1 + $0x60] sm:$0xff] }
   0x6   :  { %279 = vmatpush.bf16.msra.mxu0 %v2332_v3  ;;  %v2346_v11 = vld [vmem:[%s3101_s1 + $0xa0] sm:$0xff] }
   0x7   :  { %298 = vmatpush.bf16.msra.mxu1 %v2340_v4 }
   0x8   :  { %317 = vmatpush.bf16.msra.mxu2 %v2348_v5 }
   0xa   :  { %280 = vmatpush.bf16.msra.mxu0 %v2331_v6 }
   0xb   :  { %299 = vmatpush.bf16.msra.mxu1 %v2339_v7 }
   0xc   :  { %318 = vmatpush.bf16.msra.mxu2 %v2347_v8 }
   0xd   :  { %9 = vsyncpa [#allocation3], 0  ;;  %v2329_v13 = vld [vmem:[%s3101_s1 + $0x18] sm:$0xff]  ;;  %v40_v15 = vunpack.c.l.b16 %v22_v12  ;;  %v2479_v17 = vld [vmem:[%s3100_s0] sm:$0xff]   ;;  %vm44_vm0 = vsmask.f32 7424 }
   0xe   :  { %281 = vmatpush.bf16.msra.mxu0 %v2330_v9  ;;  %v2337_v14 = vld [vmem:[%s3101_s1 + $0x58] sm:$0xff]  ;;  %v2328_v18 = vld [vmem:[%s3101_s1 + $0x10] sm:$0xff]  ;;  %v48_v20 = vshll.u32 %v2479_v17, 16  ;;  %v2482_v24 = vld [vmem:[%s3100_s0] sm:$0xf0]  ;;  %v46_v29 = vshrl.u32 %v2479_v17, 16 }
   0xf   :  { %300 = vmatpush.bf16.msra.mxu1 %v2338_v10  ;;  %v2345_v16 = vld [vmem:[%s3101_s1 + $0x98] sm:$0xff]  ;;  %v2336_v19 = vld [vmem:[%s3101_s1 + $0x50] sm:$0xff]  ;;  %v42_v21 = vpack.c.b16 %v40_v15, %v40_v15  ;;  %v2483_v25 = vld [vmem:[%s3100_s0] sm:$0xe]  ;;  %vm77_vm1 = vcmask 1046528   ;;  %vm352_vm2 = vcmask 1041409  }
  0x10   :  { %319 = vmatpush.bf16.msra.mxu2 %v2346_v11  ;;  %v2357_v22 = vld [vmem:[%s3102_s2 + $0x38] sm:$0xff]  ;;  %v2344_v23 = vld [vmem:[%s3101_s1 + $0x90] sm:$0xff]  ;;  %v2327_v27 = vld [vmem:[%s3101_s1 + $0x8] sm:$0xff]  ;;  %v50_v30 = vrot.slane %v48_v20, 1  ;;  %v2484_v33 = vor.u32 %v2483_v25, %v2482_v24  ;;  %vm1672_vm3 = vcmask 33792   ;;  %s1705_s9 = sshll.u32 %s3104_s4, 4  ;;  %s1706_s9 = int_to_ptr.hbm [resolvable:$true] %s1705_s9 }
  0x11   :  { %1464 = vmatpush.bf16.msra.mxu3 %v2357_v22  ;;  %v2356_v26 = vld [vmem:[%s3102_s2 + $0x30] sm:$0xff]  ;;  %v2335_v28 = vld [vmem:[%s3101_s1 + $0x48] sm:$0xff]  ;;  %v53_v31 = vshll.u32 %v42_v21, 16  ;;  %v2326_v37 = vld [vmem:[%s3101_s1] sm:$0xff]  ;;  %v79_v43 = vrot.slane %v42_v21, 1 }
  0x12   :  { %282 = vmatpush.bf16.msra.mxu0 %v2329_v13  ;;  %v2343_v32 = vld [vmem:[%s3101_s1 + $0x88] sm:$0xff]  ;;  %v2491_v35 = vld [vmem:[%s3100_s0 + $0xc] sm:$0xf0]  ;;  %v2334_v38 = vld [vmem:[%s3101_s1 + $0x40] sm:$0xff]  ;;  %v51_v39 = vor.u32 %v50_v30, %v46_v29  ;;  %v78_v42 = vrot.slane %v2484_v33, 1 }
  0x13   :  { %301 = vmatpush.bf16.msra.mxu1 %v2337_v14  ;;  %v2630_v34 = vld [vmem:[%s3100_s0 + $0xc] sm:$0xff]   ;;  %v55_v40 = vrot.slane %v53_v31, 1  ;;  %v2342_v41 = vld [vmem:[%s3101_s1 + $0x80] sm:$0xff]  ;;  %v23_v44 = vld [vmem:[%s3100_s0 + $0x14] sm:$0x1] }
  0x14   :  { %320 = vmatpush.bf16.msra.mxu2 %v2345_v16  ;;  %v2355_v36 = vld [vmem:[%s3102_s2 + $0x28] sm:$0xff]  ;;  %v2365_v45 = vld [vmem:[%s3102_s2 + $0x78] sm:$0xff]  ;;  %v41_v49 = vunpack.c.l.b16 %v23_v44  ;;  %v2354_v50 = vld [vmem:[%s3102_s2 + $0x20] sm:$0xff]  ;;  %v80_v51 = vsel %vm77_vm1, %v78_v42, %v79_v43  ;;  %v60_v57 = vshll.u32 %v2630_v34, 16  ;;  %v58_v62 = vshrl.u32 %v2630_v34, 16 }
  0x15   :  { %1465 = vmatpush.bf16.msra.mxu3 %v2356_v26  ;;  %v2373_v46 = vld [vmem:[%s3102_s2 + $0xb8] sm:$0xff]  ;;  %v56_v48 = vsel %vm44_vm0, %v51_v39, %v55_v40  ;;  %v2364_v52 = vld [vmem:[%s3102_s2 + $0x70] sm:$0xff]  ;;  %v2492_v53 = vld [vmem:[%s3100_s0 + $0xc] sm:$0xe] }
  0x16   :  { %283 = vmatpush.bf16.msra.mxu0 %v2328_v18  ;;  %v2381_v47 = vld [vmem:[%s3102_s2 + $0xf8] sm:$0xff]  ;;  %v2372_v54 = vld [vmem:[%s3102_s2 + $0xb0] sm:$0xff]  ;;  %v43_v56 = vpack.c.b16 %v41_v49, %v41_v49  ;;  %v2363_v59 = vld [vmem:[%s3102_s2 + $0x68] sm:$0xff]  ;;  %v62_v63 = vrot.slane %v60_v57, 1  ;;  %v2493_v1 = vor.u32 %v2492_v53, %v2491_v35 }
  0x17   :  { %302 = vmatpush.bf16.msra.mxu1 %v2336_v19  ;;  %v2380_v55 = vld [vmem:[%s3102_s2 + $0xf0] sm:$0xff]  ;;  %v2353_v58 = vld [vmem:[%s3102_s2 + $0x18] sm:$0xff]  ;;  %v2371_v60 = vld [vmem:[%s3102_s2 + $0xa8] sm:$0xff] }
  0x18   :  { %321 = vmatpush.bf16.msra.mxu2 %v2344_v23  ;;  %v2379_v61 = vld [vmem:[%s3102_s2 + $0xe8] sm:$0xff]  ;;  %v65_v0 = vshll.u32 %v43_v56, 16  ;;  %v2362_v2 = vld [vmem:[%s3102_s2 + $0x60] sm:$0xff]  ;;  %v63_v5 = vor.u32 %v62_v63, %v58_v62  ;;  %v81_v7 = vrot.slane %v2493_v1, 1  ;;  %v82_v8 = vrot.slane %v43_v56, 1  ;;  %v2361_v9 = vld [vmem:[%s3102_s2 + $0x58] sm:$0xff] }
  0x19   :  { %1466 = vmatpush.bf16.msra.mxu3 %v2355_v36  ;;  %v2370_v3 = vld [vmem:[%s3102_s2 + $0xa0] sm:$0xff]  ;;  %v2369_v10 = vld [vmem:[%s3102_s2 + $0x98] sm:$0xff]  ;;  %v2360_v14 = vld [vmem:[%s3102_s2 + $0x50] sm:$0xff] }
  0x1a   :  { %284 = vmatpush.bf16.msra.mxu0 %v2327_v27  ;;  %v2378_v4 = vld [vmem:[%s3102_s2 + $0xe0] sm:$0xff]  ;;  %v67_v6 = vrot.slane %v65_v0, 1  ;;  %v2377_v11 = vld [vmem:[%s3102_s2 + $0xd8] sm:$0xff]  ;;  %v83_v13 = vsel %vm77_vm1, %v81_v7, %v82_v8  ;;  %v2352_v15 = vld [vmem:[%s3102_s2 + $0x10] sm:$0xff] }
  0x1b   :  { %303 = vmatpush.bf16.msra.mxu1 %v2335_v28  ;;  %v2368_v16 = vld [vmem:[%s3102_s2 + $0x90] sm:$0xff]  ;;  %v2359_v18 = vld [vmem:[%s3102_s2 + $0x48] sm:$0xff]  ;;  %v2358_v22 = vld [vmem:[%s3102_s2 + $0x40] sm:$0xff] }
  0x1c   :  { %322 = vmatpush.bf16.msra.mxu2 %v2343_v32  ;;  %v68_v12 = vsel %vm44_vm0, %v63_v5, %v67_v6  ;;  %v2351_v19 = vld [vmem:[%s3102_s2 + $0x8] sm:$0xff]  ;;  %v2397_v23 = vld [vmem:[%s3102_s2 + $0x178] sm:$0xff]  ;;  %v2350_v24 = vld [vmem:[%s3102_s2] sm:$0xff] }
  0x1d   :  { %1467 = vmatpush.bf16.msra.mxu3 %v2354_v50  ;;  %v2367_v20 = vld [vmem:[%s3102_s2 + $0x88] sm:$0xff]  ;;  %v2366_v25 = vld [vmem:[%s3102_s2 + $0x80] sm:$0xff]  ;;  %v2389_v27 = vld [vmem:[%s3102_s2 + $0x138] sm:$0xff] }
  0x1e   :  { %285 = vmatpush.bf16.msra.mxu0 %v2326_v37  ;;  %v2375_v21 = vld [vmem:[%s3102_s2 + $0xc8] sm:$0xff]  ;;  %v2374_v26 = vld [vmem:[%s3102_s2 + $0xc0] sm:$0xff]  ;;  %v2405_v28 = vld [vmem:[%s3102_s2 + $0x1b8] sm:$0xff] }
  0x1f   :  { %304 = vmatpush.bf16.msra.mxu1 %v2334_v38  ;;  %v2413_v29 = vld [vmem:[%s3102_s2 + $0x1f8] sm:$0xff]  ;;  %v2396_v30 = vld [vmem:[%s3102_s2 + $0x170] sm:$0xff]  ;;  %v2387_v35 = vld [vmem:[%s3102_s2 + $0x128] sm:$0xff] }
  0x20   :  { %323 = vmatpush.bf16.msra.mxu2 %v2342_v41  ;;  %v2388_v31 = vld [vmem:[%s3102_s2 + $0x130] sm:$0xff]  ;;  %v2403_v36 = vld [vmem:[%s3102_s2 + $0x1a8] sm:$0xff]  ;;  %v2394_v38 = vld [vmem:[%s3102_s2 + $0x160] sm:$0xff] }
  0x21   :  { %286 = vmatmul.bf16.vlgmr.msra.gmra.mxu0 %v2479_v17  ;;  %1468 = vmatpush.bf16.msra.mxu3 %v2353_v58  ;;  %v2376_v17 = vld [vmem:[%s3102_s2 + $0xd0] sm:$0xff]  ;;  %v2411_v37 = vld [vmem:[%s3102_s2 + $0x1e8] sm:$0xff]  ;;  %v2386_v39 = vld [vmem:[%s3102_s2 + $0x120] sm:$0xff] }
  0x22   :  { %1477 = vmatpush.bf16.msrb.mxu0 %v2365_v45  ;;  %305 = vmatmul.bf16.vlgmr.msra.gmra.mxu1 %v56_v48  ;;  %v2404_v32 = vld [vmem:[%s3102_s2 + $0x1b0] sm:$0xff]  ;;  %v2402_v40 = vld [vmem:[%s3102_s2 + $0x1a0] sm:$0xff]  ;;  %v2393_v42 = vld [vmem:[%s3102_s2 + $0x158] sm:$0xff] }
  0x23   :  { %1490 = vmatpush.bf16.msrb.mxu1 %v2373_v46  ;;  %324 = vmatmul.bf16.vlgmr.msra.gmra.mxu2 %v80_v51  ;;  %v2412_v33 = vld [vmem:[%s3102_s2 + $0x1f0] sm:$0xff]  ;;  %v2410_v41 = vld [vmem:[%s3102_s2 + $0x1e0] sm:$0xff]  ;;  %v2385_v43 = vld [vmem:[%s3102_s2 + $0x118] sm:$0xff] }
  0x24   :  { %1503 = vmatpush.bf16.msrb.mxu2 %v2381_v47  ;;  %v2401_v44 = vld [vmem:[%s3102_s2 + $0x198] sm:$0xff]  ;;  %v2392_v46 = vld [vmem:[%s3102_s2 + $0x150] sm:$0xff]  ;;  %v2391_v50 = vld [vmem:[%s3102_s2 + $0x148] sm:$0xff] }
  0x25   :  { %1469 = vmatpush.bf16.msra.mxu3 %v2352_v15  ;;  %v2409_v45 = vld [vmem:[%s3102_s2 + $0x1d8] sm:$0xff]  ;;  %v2384_v47 = vld [vmem:[%s3102_s2 + $0x110] sm:$0xff]  ;;  %v2383_v53 = vld [vmem:[%s3102_s2 + $0x108] sm:$0xff] }
  0x26   :  { %1478 = vmatpush.bf16.msrb.mxu0 %v2364_v52  ;;  %v2400_v48 = vld [vmem:[%s3102_s2 + $0x190] sm:$0xff]  ;;  %v2390_v56 = vld [vmem:[%s3102_s2 + $0x140] sm:$0xff] }
  0x27   :  { %1491 = vmatpush.bf16.msrb.mxu1 %v2372_v54  ;;  %v2408_v49 = vld [vmem:[%s3102_s2 + $0x1d0] sm:$0xff]  ;;  %v2399_v54 = vld [vmem:[%s3102_s2 + $0x188] sm:$0xff]  ;;  %v2382_v57 = vld [vmem:[%s3102_s2 + $0x100] sm:$0xff] }
  0x28   :  { %1504 = vmatpush.bf16.msrb.mxu2 %v2380_v55  ;;  %v2407_v55 = vld [vmem:[%s3102_s2 + $0x1c8] sm:$0xff]  ;;  %v2398_v58 = vld [vmem:[%s3102_s2 + $0x180] sm:$0xff] }
  0x29   :  { %1470 = vmatpush.bf16.msra.mxu3 %v2351_v19 }
  0x2a   :  { %1479 = vmatpush.bf16.msrb.mxu0 %v2363_v59  ;;  %v2406_v59 = vld [vmem:[%s3102_s2 + $0x1c0] sm:$0xff] }
  0x2b   :  { %1492 = vmatpush.bf16.msrb.mxu1 %v2371_v60 }
  0x2c   :  { %1505 = vmatpush.bf16.msrb.mxu2 %v2379_v61 }
  0x2d   :  { %1471 = vmatpush.bf16.msra.mxu3 %v2350_v24 }
  0x2e   :  { %1480 = vmatpush.bf16.msrb.mxu0 %v2362_v2 }
  0x2f   :  { %1493 = vmatpush.bf16.msrb.mxu1 %v2370_v3 }
  0x30   :  { %1506 = vmatpush.bf16.msrb.mxu2 %v2378_v4 }
  0x31   :  { %291 = vmatmul.bf16.gmra.mxu0 %v2630_v34  ;;  %1516 = vmatpush.bf16.msrb.mxu3 %v2389_v27  ;;  %v2395_v34 = vld [vmem:[%s3102_s2 + $0x168] sm:$0xff] }
  0x32   :  { %1481 = vmatpush.bf16.msrb.mxu0 %v2361_v9  ;;  %310 = vmatmul.bf16.gmra.mxu1 %v68_v12 }
  0x33   :  { %1494 = vmatpush.bf16.msrb.mxu1 %v2369_v10  ;;  %329 = vmatmul.bf16.gmra.mxu2 %v83_v13 }
  0x34   :  { %1507 = vmatpush.bf16.msrb.mxu2 %v2377_v11 }
  0x35   :  { %1517 = vmatpush.bf16.msrb.mxu3 %v2388_v31  ;;  %v2445_v31 = vld [vmem:[%s3102_s2 + $0x2f8] sm:$0xff] }
  0x36   :  { %1482 = vmatpush.bf16.msrb.mxu0 %v2360_v14 }
  0x37   :  { %1495 = vmatpush.bf16.msrb.mxu1 %v2368_v16 }
  0x38   :  { %1508 = vmatpush.bf16.msrb.mxu2 %v2376_v17  ;;  %v2429_v17 = vld [vmem:[%s3102_s2 + $0x278] sm:$0xff] }
  0x39   :  { %1518 = vmatpush.bf16.msrb.mxu3 %v2387_v35  ;;  %v2428_v35 = vld [vmem:[%s3102_s2 + $0x270] sm:$0xff] }
  0x3a   :  { %1483 = vmatpush.bf16.msrb.mxu0 %v2359_v18 }
  0x3b   :  { %1496 = vmatpush.bf16.msrb.mxu1 %v2367_v20 }
  0x3c   :  { %1509 = vmatpush.bf16.msrb.mxu2 %v2375_v21 }
  0x3d   :  { %1519 = vmatpush.bf16.msrb.mxu3 %v2386_v39  ;;  %v2436_v39 = vld [vmem:[%s3102_s2 + $0x2b0] sm:$0xff] }
  0x3e   :  { %1484 = vmatpush.bf16.msrb.mxu0 %v2358_v22 }
  0x3f   :  { %1497 = vmatpush.bf16.msrb.mxu1 %v2366_v25 }
  0x40   :  { %1510 = vmatpush.bf16.msrb.mxu2 %v2374_v26  ;;  %v2421_v26 = vld [vmem:[%s3102_s2 + $0x238] sm:$0xff] }
  0x41   :  { %1520 = vmatpush.bf16.msrb.mxu3 %v2385_v43 }
  0x42   :  { %1529 = vmatpush.bf16.msra.mxu0 %v2397_v23 }
  0x43   :  { %1542 = vmatpush.bf16.msra.mxu1 %v2405_v28 }
  0x44   :  { %1555 = vmatpush.bf16.msra.mxu2 %v2413_v29 }
  0x45   :  { %1521 = vmatpush.bf16.msrb.mxu3 %v2384_v47  ;;  %v2443_v47 = vld [vmem:[%s3102_s2 + $0x2e8] sm:$0xff] }
  0x46   :  { %1530 = vmatpush.bf16.msra.mxu0 %v2396_v30  ;;  %v2437_v30 = vld [vmem:[%s3102_s2 + $0x2b8] sm:$0xff] }
  0x47   :  { %1543 = vmatpush.bf16.msra.mxu1 %v2404_v32 }
  0x48   :  { %1556 = vmatpush.bf16.msra.mxu2 %v2412_v33 }
  0x49   :  { %1522 = vmatpush.bf16.msrb.mxu3 %v2383_v53 }
  0x4a   :  { %1531 = vmatpush.bf16.msra.mxu0 %v2395_v34 }
  0x4b   :  { %1544 = vmatpush.bf16.msra.mxu1 %v2403_v36 }
  0x4c   :  { %1557 = vmatpush.bf16.msra.mxu2 %v2411_v37  ;;  %v2420_v37 = vld [vmem:[%s3102_s2 + $0x230] sm:$0xff] }
  0x4d   :  { %1523 = vmatpush.bf16.msrb.mxu3 %v2382_v57 }
  0x4e   :  { %1532 = vmatpush.bf16.msra.mxu0 %v2394_v38 }
  0x4f   :  { %1545 = vmatpush.bf16.msra.mxu1 %v2402_v40  ;;  %v2444_v40 = vld [vmem:[%s3102_s2 + $0x2f0] sm:$0xff] }
  0x50   :  { %1558 = vmatpush.bf16.msra.mxu2 %v2410_v41  ;;  %v2427_v41 = vld [vmem:[%s3102_s2 + $0x268] sm:$0xff] }
  0x52   :  { %1533 = vmatpush.bf16.msra.mxu0 %v2393_v42 }
  0x53   :  { %1546 = vmatpush.bf16.msra.mxu1 %v2401_v44  ;;  %v2419_v44 = vld [vmem:[%s3102_s2 + $0x228] sm:$0xff] }
  0x54   :  { %1559 = vmatpush.bf16.msra.mxu2 %v2409_v45 }
  0x56   :  { %1534 = vmatpush.bf16.msra.mxu0 %v2392_v46  ;;  %v2435_v46 = vld [vmem:[%s3102_s2 + $0x2a8] sm:$0xff] }
  0x57   :  { %1547 = vmatpush.bf16.msra.mxu1 %v2400_v48 }
  0x58   :  { %1560 = vmatpush.bf16.msra.mxu2 %v2408_v49  ;;  %v2426_v49 = vld [vmem:[%s3102_s2 + $0x260] sm:$0xff] }
  0x5a   :  { %1535 = vmatpush.bf16.msra.mxu0 %v2391_v50 }
  0x5b   :  { %1548 = vmatpush.bf16.msra.mxu1 %v2399_v54 }
  0x5c   :  { %1561 = vmatpush.bf16.msra.mxu2 %v2407_v55  ;;  %v2418_v55 = vld [vmem:[%s3102_s2 + $0x220] sm:$0xff] }
  0x5e   :  { %1536 = vmatpush.bf16.msra.mxu0 %v2390_v56 }
  0x5f   :  { %1549 = vmatpush.bf16.msra.mxu1 %v2398_v58  ;;  %v2434_v58 = vld [vmem:[%s3102_s2 + $0x2a0] sm:$0xff] }
  0x60   :  { %1562 = vmatpush.bf16.msra.mxu2 %v2406_v59  ;;  %v2442_v59 = vld [vmem:[%s3102_s2 + $0x2e0] sm:$0xff] }
  0x9e   :  { %v287_v51 = vpop.f32.mrf.mxu0 }
  0x9f   :  { %v306_v52 = vpop.f32.mrf.mxu1 }
  0xa0   :  { %v307_v61 = vadd.f32 %v306_v52, %v287_v51 }
  0xa6   :  { %v325_v60 = vpop.f32.mrf.mxu2  ;;  %v289_v62 = vpop.f32.mrf.mxu0 }
  0xa7   :  { %v308_v63 = vpop.f32.mrf.mxu1  ;;  %v326_v0 = vadd.f32 %v325_v60, %v307_v61 }
  0xa8   :  { %v309_v42 = vadd.f32 %v308_v63, %v289_v62 }
  0xa9   :  { %v335_v2 = vmax.f32 %v326_v0, 0.0 }
  0xab   :  { %v339_v5 = vpack.c.bf16 %v335_v2, %v335_v2 }
  0xad   :  { %v345_v8 = vunpack.c.l.b16 %v339_v5 }
  0xae   :  { %v327_v1 = vpop.f32.mrf.mxu2  ;;  %v292_v3 = vpop.f32.mrf.mxu0 }
  0xaf   :  { %v311_v4 = vpop.f32.mrf.mxu1  ;;  %v2843_v11 = vunpack.i.l.s16 %v345_v8  ;;  %v328_v45 = vadd.f32 %v327_v1, %v309_v42  ;;  %v2425_v1 = vld [vmem:[%s3102_s2 + $0x258] sm:$0xff] }
  0xb0   :  { %v312_v6 = vadd.f32 %v311_v4, %v292_v3  ;;  %v2433_v8 = vld [vmem:[%s3102_s2 + $0x298] sm:$0xff] }
  0xb1   :  { %v356_v15 = vrot.slane %v2843_v11, 1  ;;  %v360_v19 = vrot.slane %v2843_v11, 2  ;;  %v365_v22 = vrot.slane %v2843_v11, 3  ;;  %v375_v52 = vrot.slane %v2843_v11, 5 }
  0xb2   :  { %v370_v56 = vrot.slane %v2843_v11, 4  ;;  %v336_v57 = vmax.f32 %v328_v45, 0.0  ;;  %v380_v61 = vrot.slane %v2843_v11, 6  ;;  %v385_v62 = vrot.slane %v2843_v11, 7  ;;  %v2452_v45 = vld [vmem:[%s3102_s2 + $0x330] sm:$0xff] }
  0xb4   :  { %v340_v5 = vpack.c.bf16 %v336_v57, %v336_v57  ;;  %v2474_v57 = vld [vmem:[%s3102_s2 + $0x3e0] sm:$0xff] }
  0xb6   :  { %v330_v7 = vpop.f32.mrf.mxu2  ;;  %v294_v32 = vpop.f32.mrf.mxu0 }
  0xb7   :  { %v331_v9 = vadd.f32 %v330_v7, %v312_v6  ;;  %v313_v33 = vpop.f32.mrf.mxu1  ;;  %v2417_v7 = vld [vmem:[%s3102_s2 + $0x218] sm:$0xff] }
  0xb8   :  { %v314_v38 = vadd.f32 %v313_v33, %v294_v32  ;;  %v2438_v32 = vld [vmem:[%s3102_s2 + $0x2c0] sm:$0xff]  ;;  %v2453_v33 = vld [vmem:[%s3102_s2 + $0x338] sm:$0xff] }
  0xb9   :  { %v337_v10 = vmax.f32 %v331_v9, 0.0 }
  0xbb   :  { %v341_v12 = vpack.c.bf16 %v337_v10, %v337_v10 }
  0xbd   :  { %v346_v13 = vunpack.c.l.b16 %v341_v12 }
  0xbe   :  { %v332_v36 = vpop.f32.mrf.mxu2 }
  0xbf   :  { %v2845_v14 = vunpack.i.l.s16 %v346_v13  ;;  %v333_v43 = vadd.f32 %v332_v36, %v314_v38  ;;  %v2424_v13 = vld [vmem:[%s3102_s2 + $0x250] sm:$0xff]  ;;  %v2477_v36 = vld [vmem:[%s3102_s2 + $0x3f8] sm:$0xff] }
  0xc1   :  { %v357_v16 = vsel %vm352_vm2, %v2845_v14, %v356_v15  ;;  %v351_v18 = vrot.slane %v2845_v14, 7  ;;  %v361_v20 = vrot.slane %v2845_v14, 1  ;;  %v366_v23 = vrot.slane %v2845_v14, 2  ;;  %v2416_v15 = vld [vmem:[%s3102_s2 + $0x210] sm:$0xff] }
  0xc2   :  { %v358_v21 = vpack.c.b16 %v357_v16, %v357_v16  ;;  %v376_v48 = vrot.slane %v2845_v14, 4  ;;  %v371_v50 = vrot.slane %v2845_v14, 3  ;;  %v338_v51 = vmax.f32 %v333_v43, 0.0  ;;  %v2432_v16 = vld [vmem:[%s3102_s2 + $0x290] sm:$0xff] }
  0xc3   :  { %v353_v24 = vsel %vm352_vm2, %v351_v18, %v2843_v11  ;;  %v362_v25 = vsel %vm352_vm2, %v361_v20, %v360_v19  ;;  %v367_v29 = vsel %vm352_vm2, %v366_v23, %v365_v22  ;;  %v381_v53 = vrot.slane %v2845_v14, 5  ;;  %v2441_v11 = vld [vmem:[%s3102_s2 + $0x2d8] sm:$0xff]  ;;  %v2423_v19 = vld [vmem:[%s3102_s2 + $0x248] sm:$0xff] }
  0xc4   :  { %1485 = vmatmul.bf16.vlgmr.msrb.gmra.mxu0 %v358_v21  ;;  %v354_v27 = vpack.c.b16 %v353_v24, %v353_v24  ;;  %v363_v28 = vpack.c.b16 %v362_v25, %v362_v25  ;;  %v368_v34 = vpack.c.b16 %v367_v29, %v367_v29  ;;  %v386_v54 = vrot.slane %v2845_v14, 6  ;;  %v2415_v21 = vld [vmem:[%s3102_s2 + $0x208] sm:$0xff]  ;;  %v2422_v24 = vld [vmem:[%s3102_s2 + $0x240] sm:$0xff] }
  0xc5   :  { %1581 = vmatpush.bf16.msrb.mxu0 %v2429_v17  ;;  %v377_v60 = vsel %vm352_vm2, %v376_v48, %v375_v52  ;;  %v372_v63 = vsel %vm352_vm2, %v371_v50, %v370_v56  ;;  %v342_v0 = vpack.c.bf16 %v338_v51, %v338_v51  ;;  %v382_v2 = vsel %vm352_vm2, %v381_v53, %v380_v61  ;;  %v2440_v17 = vld [vmem:[%s3102_s2 + $0x2d0] sm:$0xff]  ;;  %v2431_v22 = vld [vmem:[%s3102_s2 + $0x288] sm:$0xff]  ;;  %v2430_v29 = vld [vmem:[%s3102_s2 + $0x280] sm:$0xff] }
  0xc6   :  { %1472 = vmatmul.bf16.vlgmr.msra.gmra.mxu3 %v354_v27  ;;  %1498 = vmatmul.bf16.vlgmr.msrb.gmra.mxu1 %v363_v28  ;;  %v387_v3 = vsel %vm352_vm2, %v386_v54, %v385_v62  ;;  %v378_v4 = vpack.c.b16 %v377_v60, %v377_v60  ;;  %v373_v6 = vpack.c.b16 %v372_v63, %v372_v63  ;;  %v392_v14 = vunpack.c.l.b16 %v340_v5  ;;  %v2439_v23 = vld [vmem:[%s3102_s2 + $0x2c8] sm:$0xff]  ;;  %v2414_v28 = vld [vmem:[%s3102_s2 + $0x200] sm:$0xff]  ;;  %v2476_v48 = vld [vmem:[%s3102_s2 + $0x3f0] sm:$0xff] }
  0xc7   :  { %1511 = vmatmul.bf16.vlgmr.msrb.gmra.mxu2 %v368_v34  ;;  %1568 = vmatpush.bf16.msra.mxu3 %v2421_v26  ;;  %v383_v9 = vpack.c.b16 %v382_v2, %v382_v2  ;;  %v388_v10 = vpack.c.b16 %v387_v3, %v387_v3  ;;  %v393_v12 = vunpack.c.l.b16 %v342_v0  ;;  %v2461_v26 = vld [vmem:[%s3102_s2 + $0x378] sm:$0xff]  ;;  %v2459_v50 = vld [vmem:[%s3102_s2 + $0x368] sm:$0xff]  ;;  %v2458_v54 = vld [vmem:[%s3102_s2 + $0x360] sm:$0xff] }
  0xc8   :  { %1594 = vmatpush.bf16.msrb.mxu1 %v2437_v30  ;;  %1607 = vmatpush.bf16.msrb.mxu2 %v2445_v31  ;;  %v2948_v20 = vunpack.i.l.s16 %v392_v14  ;;  %v2451_v51 = vld [vmem:[%s3102_s2 + $0x328] sm:$0xff]  ;;  %v2466_v56 = vld [vmem:[%s3102_s2 + $0x3a0] sm:$0xff]  ;;  %v2465_v60 = vld [vmem:[%s3102_s2 + $0x398] sm:$0xff] }
  0xc9   :  { %1582 = vmatpush.bf16.msrb.mxu0 %v2428_v35  ;;  %v2943_v18 = vunpack.i.l.s16 %v393_v12  ;;  %v2469_v35 = vld [vmem:[%s3102_s2 + $0x3b8] sm:$0xff]  ;;  %v2467_v52 = vld [vmem:[%s3102_s2 + $0x3a8] sm:$0xff]  ;;  %v2456_v62 = vld [vmem:[%s3102_s2 + $0x350] sm:$0xff] }
  0xca   :  { %v402_v30 = vrot.slane %v2948_v20, 1  ;;  %v406_v34 = vrot.slane %v2948_v20, 2  ;;  %v2475_v53 = vld [vmem:[%s3102_s2 + $0x3e8] sm:$0xff]  ;;  %v2473_v61 = vld [vmem:[%s3102_s2 + $0x3d8] sm:$0xff]  ;;  %v2448_v63 = vld [vmem:[%s3102_s2 + $0x310] sm:$0xff] }
  0xcb   :  { %1569 = vmatpush.bf16.msra.mxu3 %v2420_v37  ;;  %v398_v25 = vrot.slane %v2943_v18, 7  ;;  %v407_v27 = vrot.slane %v2943_v18, 1  ;;  %v412_v31 = vrot.slane %v2943_v18, 2  ;;  %v2464_v0 = vld [vmem:[%s3102_s2 + $0x390] sm:$0xff]  ;;  %v2455_v2 = vld [vmem:[%s3102_s2 + $0x348] sm:$0xff]  ;;  %v2446_v12 = vld [vmem:[%s3102_s2 + $0x300] sm:$0xff] }
  0xcc   :  { %1595 = vmatpush.bf16.msrb.mxu1 %v2436_v39  ;;  %1608 = vmatpush.bf16.msrb.mxu2 %v2444_v40  ;;  %v403_v37 = vsel %vm352_vm2, %v2943_v18, %v402_v30  ;;  %v411_v39 = vrot.slane %v2948_v20, 3  ;;  %v2447_v3 = vld [vmem:[%s3102_s2 + $0x308] sm:$0xff]  ;;  %v2462_v14 = vld [vmem:[%s3102_s2 + $0x380] sm:$0xff] }
  0xcd   :  { %1583 = vmatpush.bf16.msrb.mxu0 %v2427_v41  ;;  %v399_v38 = vsel %vm352_vm2, %v398_v25, %v2948_v20  ;;  %v408_v40 = vsel %vm352_vm2, %v407_v27, %v406_v34  ;;  %v2460_v41 = vld [vmem:[%s3102_s2 + $0x370] sm:$0xff]  ;;  %v404_v43 = vpack.c.b16 %v403_v37, %v403_v37  ;;  %v2471_v5 = vld [vmem:[%s3102_s2 + $0x3c8] sm:$0xff]  ;;  %v2486_v37 = vld [vmem:[%s3103_s3] ss:$0 sm:$0xff]  ;;  %s2520_s3 = smov [#allocation2]  }
  0xce   :  { %v413_v42 = vsel %vm352_vm2, %v412_v31, %v411_v39  ;;  %s1703_s6 = sshll.u32 %s2520_s3, 4  ;;  %s1704_s6 = int_to_ptr.vmem [resolvable:$true] %s1703_s6 }
  0xcf   :  { %1570 = vmatpush.bf16.msra.mxu3 %v2419_v44  ;;  %v400_v44 = vpack.c.b16 %v399_v38, %v399_v38 }
  0xd0   :  { %1596 = vmatpush.bf16.msrb.mxu1 %v2435_v46  ;;  %1609 = vmatpush.bf16.msrb.mxu2 %v2443_v47  ;;  %v409_v46 = vpack.c.b16 %v408_v40, %v408_v40  ;;  %v2468_v47 = vld [vmem:[%s3102_s2 + $0x3b0] sm:$0xff] }
  0xd1   :  { %1584 = vmatpush.bf16.msrb.mxu0 %v2426_v49  ;;  %v414_v49 = vpack.c.b16 %v413_v42, %v413_v42 }
  0xd3   :  { %1571 = vmatpush.bf16.msra.mxu3 %v2418_v55  ;;  %v2450_v55 = vld [vmem:[%s3102_s2 + $0x320] sm:$0xff] }
  0xd4   :  { %1597 = vmatpush.bf16.msrb.mxu1 %v2434_v58  ;;  %1610 = vmatpush.bf16.msrb.mxu2 %v2442_v59  ;;  %v2457_v58 = vld [vmem:[%s3102_s2 + $0x358] sm:$0xff] }
  0xd5   :  { %1537 = vmatmul.bf16.vlgmr.msra.gmra.mxu0 %v378_v4  ;;  %v2449_v59 = vld [vmem:[%s3102_s2 + $0x318] sm:$0xff]  ;;  %v2463_v4 = vld [vmem:[%s3102_s2 + $0x388] sm:$0xff] }
  0xd6   :  { %1585 = vmatpush.bf16.msrb.mxu0 %v2425_v1  ;;  %1524 = vmatmul.bf16.vlgmr.msrb.gmra.mxu3 %v373_v6  ;;  %v2472_v1 = vld [vmem:[%s3102_s2 + $0x3d0] sm:$0xff]  ;;  %v422_v6 = vrot.slane %v2943_v18, 4 }
  0xd7   :  { %1550 = vmatmul.bf16.vlgmr.msra.gmra.mxu1 %v383_v9  ;;  %1563 = vmatmul.bf16.vlgmr.msra.gmra.mxu2 %v388_v10  ;;  %v421_v9 = vrot.slane %v2948_v20, 5  ;;  %v427_v10 = vrot.slane %v2943_v18, 5 }
  0xd8   :  { %1572 = vmatpush.bf16.msra.mxu3 %v2417_v7  ;;  %1598 = vmatpush.bf16.msrb.mxu1 %v2433_v8  ;;  %v417_v7 = vrot.slane %v2943_v18, 3  ;;  %v2454_v8 = vld [vmem:[%s3102_s2 + $0x340] sm:$0xff] }
  0xd9   :  { %1611 = vmatpush.bf16.msrb.mxu2 %v2441_v11  ;;  %v432_v11 = vrot.slane %v2943_v18, 6  ;;  %v431_v18 = vrot.slane %v2948_v20, 7 }
  0xda   :  { %1586 = vmatpush.bf16.msrb.mxu0 %v2424_v13  ;;  %v416_v13 = vrot.slane %v2948_v20, 4 }
  0xdc   :  { %1573 = vmatpush.bf16.msra.mxu3 %v2416_v15  ;;  %1599 = vmatpush.bf16.msrb.mxu1 %v2432_v16  ;;  %v2470_v15 = vld [vmem:[%s3102_s2 + $0x3c0] sm:$0xff]  ;;  %v423_v16 = vsel %vm352_vm2, %v422_v6, %v421_v9 }
  0xdd   :  { %1612 = vmatpush.bf16.msrb.mxu2 %v2440_v17  ;;  %v426_v17 = vrot.slane %v2948_v20, 6 }
  0xde   :  { %1587 = vmatpush.bf16.msrb.mxu0 %v2423_v19  ;;  %v418_v19 = vsel %vm352_vm2, %v417_v7, %v416_v13 }
  0xe0   :  { %1574 = vmatpush.bf16.msra.mxu3 %v2415_v21  ;;  %1600 = vmatpush.bf16.msrb.mxu1 %v2431_v22  ;;  %v428_v21 = vsel %vm352_vm2, %v427_v10, %v426_v17  ;;  %v433_v22 = vsel %vm352_vm2, %v432_v11, %v431_v18 }
  0xe1   :  { %1613 = vmatpush.bf16.msrb.mxu2 %v2439_v23  ;;  %v424_v23 = vpack.c.b16 %v423_v16, %v423_v16  ;;  %v429_v25 = vpack.c.b16 %v428_v21, %v428_v21 }
  0xe2   :  { %1588 = vmatpush.bf16.msrb.mxu0 %v2422_v24  ;;  %v419_v24 = vpack.c.b16 %v418_v19, %v418_v19 }
  0xe4   :  { %1575 = vmatpush.bf16.msra.mxu3 %v2414_v28  ;;  %1601 = vmatpush.bf16.msrb.mxu1 %v2430_v29 }
  0xe5   :  { %1614 = vmatpush.bf16.msrb.mxu2 %v2438_v32  ;;  %1589 = vmatmul.bf16.vlgmr.msrb.gmra.mxu0 %v404_v43 }
  0xe6   :  { %1633 = vmatpush.bf16.msra.mxu0 %v2461_v26  ;;  %v434_v26 = vpack.c.b16 %v433_v22, %v433_v22 }
  0xe7   :  { %1576 = vmatmul.bf16.vlgmr.msra.gmra.mxu3 %v400_v44  ;;  %1602 = vmatmul.bf16.vlgmr.msrb.gmra.mxu1 %v409_v46 }
  0xe8   :  { %1620 = vmatpush.bf16.msrb.mxu3 %v2453_v33  ;;  %1646 = vmatpush.bf16.msra.mxu1 %v2469_v35 }
  0xe9   :  { %1659 = vmatpush.bf16.msra.mxu2 %v2477_v36 }
  0xea   :  { %1634 = vmatpush.bf16.msra.mxu0 %v2460_v41  ;;  %1615 = vmatmul.bf16.vlgmr.msrb.gmra.mxu2 %v414_v49 }
  0xec   :  { %1621 = vmatpush.bf16.msrb.mxu3 %v2452_v45  ;;  %1647 = vmatpush.bf16.msra.mxu1 %v2468_v47 }
  0xed   :  { %1660 = vmatpush.bf16.msra.mxu2 %v2476_v48 }
  0xee   :  { %1635 = vmatpush.bf16.msra.mxu0 %v2459_v50 }
  0xf0   :  { %1622 = vmatpush.bf16.msrb.mxu3 %v2451_v51  ;;  %1648 = vmatpush.bf16.msra.mxu1 %v2467_v52 }
  0xf1   :  { %1661 = vmatpush.bf16.msra.mxu2 %v2475_v53 }
  0xf2   :  { %1636 = vmatpush.bf16.msra.mxu0 %v2458_v54 }
  0xf4   :  { %1623 = vmatpush.bf16.msrb.mxu3 %v2450_v55  ;;  %1649 = vmatpush.bf16.msra.mxu1 %v2466_v56 }
  0xf5   :  { %1662 = vmatpush.bf16.msra.mxu2 %v2474_v57 }
  0xf6   :  { %1637 = vmatpush.bf16.msra.mxu0 %v2457_v58 }
  0xf8   :  { %1624 = vmatpush.bf16.msrb.mxu3 %v2449_v59  ;;  %1650 = vmatpush.bf16.msra.mxu1 %v2465_v60 }
  0xf9   :  { %1663 = vmatpush.bf16.msra.mxu2 %v2473_v61 }
  0xfa   :  { %1638 = vmatpush.bf16.msra.mxu0 %v2456_v62 }
  0xfc   :  { %1625 = vmatpush.bf16.msrb.mxu3 %v2448_v63  ;;  %1651 = vmatpush.bf16.msra.mxu1 %v2464_v0 }
  0xfd   :  { %1664 = vmatpush.bf16.msra.mxu2 %v2472_v1 }
  0xfe   :  { %1639 = vmatpush.bf16.msra.mxu0 %v2455_v2 }
 0x100   :  { %1626 = vmatpush.bf16.msrb.mxu3 %v2447_v3  ;;  %1652 = vmatpush.bf16.msra.mxu1 %v2463_v4 }
 0x101   :  { %1665 = vmatpush.bf16.msra.mxu2 %v2471_v5 }
 0x102   :  { %1640 = vmatpush.bf16.msra.mxu0 %v2454_v8 }
 0x104   :  { %1627 = vmatpush.bf16.msrb.mxu3 %v2446_v12  ;;  %1653 = vmatpush.bf16.msra.mxu1 %v2462_v14 }
 0x105   :  { %1666 = vmatpush.bf16.msra.mxu2 %v2470_v15  ;;  %1641 = vmatmul.bf16.vlgmr.msra.gmra.mxu0 %v424_v23 }
 0x107   :  { %1628 = vmatmul.bf16.vlgmr.msrb.gmra.mxu3 %v419_v24  ;;  %1654 = vmatmul.bf16.vlgmr.msra.gmra.mxu1 %v429_v25 }
 0x108   :  { %1667 = vmatmul.bf16.vlgmr.msra.gmra.mxu2 %v434_v26 }
 0x141   :  { %v1486_v27 = vpop.f32.mrf.mxu0 }
 0x143   :  { %v1499_v20 = vpop.f32.mrf.mxu1 }
 0x149   :  { %v1473_v28 = vpop.f32.mrf.mxu3  ;;  %v1488_v29 = vpop.f32.mrf.mxu0 }
 0x14a   :  { %v1512_v30 = vpop.f32.mrf.mxu2  ;;  %v1474_v41 = vadd.f32 %v2486_v37, %v1473_v28 }
 0x14b   :  { %v1501_v31 = vpop.f32.mrf.mxu1 }
 0x14c   :  { %v1487_v43 = vadd.f32 %v1486_v27, %v1474_v41 }
 0x14e   :  { %v1500_v47 = vadd.f32 %v1499_v20, %v1487_v43 }
 0x150   :  { %v1513_v48 = vadd.f32 %v1512_v30, %v1500_v47 }
 0x151   :  { %v1475_v32 = vpop.f32.mrf.mxu3 }
 0x152   :  { %v1514_v33 = vpop.f32.mrf.mxu2  ;;  %v1538_v34 = vpop.f32.mrf.mxu0 }
 0x154   :  { %v1551_v35 = vpop.f32.mrf.mxu1 }
 0x159   :  { %v1525_v36 = vpop.f32.mrf.mxu3 }
 0x15a   :  { %v1540_v38 = vpop.f32.mrf.mxu0  ;;  %v1564_v39 = vpop.f32.mrf.mxu2  ;;  %v1526_v50 = vadd.f32 %v1525_v36, %v1513_v48 }
 0x15c   :  { %v1553_v40 = vpop.f32.mrf.mxu1  ;;  %v1539_v54 = vadd.f32 %v1538_v34, %v1526_v50 }
 0x15e   :  { %v1552_v56 = vadd.f32 %v1551_v35, %v1539_v54 }
 0x160   :  { %v1565_v58 = vadd.f32 %v1564_v39, %v1552_v56 }
 0x161   :  { %v1527_v42 = vpop.f32.mrf.mxu3 }
 0x162   :  { %v1566_v44 = vpop.f32.mrf.mxu2  ;;  %v1590_v45 = vpop.f32.mrf.mxu0 }
 0x164   :  { %v1603_v46 = vpop.f32.mrf.mxu1 }
 0x16a   :  { %v1577_v49 = vpop.f32.mrf.mxu3  ;;  %v1592_v51 = vpop.f32.mrf.mxu0 }
 0x16b   :  { %v1578_v59 = vadd.f32 %v1577_v49, %v1565_v58 }
 0x16c   :  { %v1605_v53 = vpop.f32.mrf.mxu1 }
 0x16d   :  { %v1616_v52 = vpop.f32.mrf.mxu2  ;;  %v1591_v60 = vadd.f32 %v1590_v45, %v1578_v59 }
 0x16f   :  { %v1604_v62 = vadd.f32 %v1603_v46, %v1591_v60 }
 0x171   :  { %v1617_v0 = vadd.f32 %v1616_v52, %v1604_v62 }
 0x172   :  { %v1579_v55 = vpop.f32.mrf.mxu3 }
 0x175   :  { %v1618_v57 = vpop.f32.mrf.mxu2 }
 0x182   :  { %v1642_v61 = vpop.f32.mrf.mxu0 }
 0x184   :  { %v1655_v63 = vpop.f32.mrf.mxu1 }
 0x18a   :  { %v1629_v1 = vpop.f32.mrf.mxu3  ;;  %v1644_v3 = vpop.f32.mrf.mxu0 }
 0x18b   :  { %v1630_v2 = vadd.f32 %v1629_v1, %v1617_v0  ;;  %v1668_v4 = vpop.f32.mrf.mxu2 }
 0x18c   :  { %v1657_v6 = vpop.f32.mrf.mxu1 }
 0x18d   :  { %v1643_v5 = vadd.f32 %v1642_v61, %v1630_v2 }
 0x18f   :  { %v1656_v7 = vadd.f32 %v1655_v63, %v1643_v5 }
 0x191   :  { %v1669_v8 = vadd.f32 %v1668_v4, %v1656_v7 }
 0x192   :  { %v1631_v9 = vpop.f32.mrf.mxu3 }
 0x193   :  { %v1670_v10 = vpop.f32.mrf.mxu2  ;;  %v1673_v11 = vsel %vm1672_vm3, %v1669_v8, -inf }
 0x194   :  { %1674 = vmax.xlane.f32.xlu0 %v1673_v11 }
 0x207   :  { %v1675_v12 = vpop.xlane.xlu0 %1674 }
 0x208   :  { %v1676_v13 = vsub.f32 %v1669_v8, %v1675_v12 }
 0x20a   :  { %v1677_v14 = vmul.f32 1.442695, %v1676_v13 }
 0x20c   :  { %2487 = vpow2.f32 %v1677_v14 }
 0x212   :  { %v2488_v15 = vpop.eup %2487 }
 0x213   :  { %v1679_v16 = vsel %vm1672_vm3, %v2488_v15, 0.0 }
 0x214   :  { %1680 = vadd.xlane.f32.xlu0 %v1679_v16 }
 0x287   :  { %v1681_v17 = vpop.xlane.xlu0 %1680 }
 0x288   :  { %2489 = vrcp.f32 %v1681_v17  ;;  %v1693_v22 = vand.u32 2147483648, %v1681_v17  ;;  %v1691_v24 = vand.u32 2147483647, %v1681_v17  ;;  %vm1687_vm5 = vweird.f32 %v1681_v17 }
 0x28a   :  { %v1694_v26 = vor.u32 1.1754944e-38, %v1693_v22  ;;  %vm1692_vm7 = vcmp.eq.f32.partialorder %v1691_v24, 8.507059e+37 }
 0x28e   :  { %v2490_v18 = vpop.eup %2489 }
 0x28f   :  { %v1683_v19 = vmul.f32 %v2490_v18, %v1681_v17  ;;  %vm1688_vm4 = vweird.f32 %v2490_v18 }
 0x290   :  { %vm1689_vm6 = vmor %vm1687_vm5, %vm1688_vm4 }
 0x291   :  { %v1684_v21 = vsub.f32 1.0, %v1683_v19 }
 0x293   :  { %v1685_v23 = vmul.f32 %v2490_v18, %v1684_v21 }
 0x295   :  { %v1686_v25 = vadd.f32 %v2490_v18, %v1685_v23 }
 0x297   :  { %v1690_v27 = vsel %vm1689_vm6, %v2490_v18, %v1686_v25 }
 0x298   :  { %v1695_v20 = vsel %vm1692_vm7, %v1694_v26, %v1690_v27 }
 0x299   :  { %v1696_v28 = vmul.f32 %v2488_v15, %v1695_v20 }
 0x29b   :  { %1697 = vst.msk [vmem:[#allocation2] sm:$0x3] %vm1672_vm3, %v1696_v28 }
 0x29c   :  { %1708 = dma.vmem_to_hbm [thread:$0]  %s1704_s6, 32, %s1706_s9, [#allocation3]  }
 0x29d   :  { %2518 = dma.done.wait [#allocation3], 32  }
 0x29e   :  { %2519 = vsyncadd [#allocation3], 4294967264 }
 0x29f   :  { %1713 = vsyncpa [#allocation3], 1 }

</bundles_post_ra>
